<compile_context>
chip_gen: v7x
topology: tpu7x:2x2x1
jax: 0.10.0
libtpu: 0.0.40
codegen_flags: <defaults>
</compile_context>

<pallas_src>
import jax
import jax.numpy as jnp
from jax.experimental import pallas as pl
from jax.experimental.pallas import tpu as pltpu


# ----------------------------------------------------------------------------
# Pallas kernel: one whole-array HBM->HBM DMA (only used when a copy is forced)
# ----------------------------------------------------------------------------
def _dma_copy_kernel(x_hbm, o_hbm, sem):
    # StraightThrough.forward(input) -> input : pure byte-for-byte copy.
    cp = pltpu.make_async_copy(x_hbm, o_hbm, sem)
    cp.start()
    cp.wait()


def _pallas_identity_copy(x: jax.Array) -> jax.Array:
    """Materialize a fresh copy of `x` via a single HBM->HBM DMA."""
    itemsize = jnp.dtype(x.dtype).itemsize
    return pl.pallas_call(
        _dma_copy_kernel,
        out_shape=jax.ShapeDtypeStruct(x.shape, x.dtype),
        in_specs=[pl.BlockSpec(memory_space=pl.ANY)],   # raw HBM ref, no auto-DMA
        out_specs=pl.BlockSpec(memory_space=pl.ANY),    # raw HBM ref, no auto-DMA
        scratch_shapes=[pltpu.SemaphoreType.DMA],
        cost_estimate=pl.CostEstimate(
            flops=0, transcendentals=0,
            bytes_accessed=2 * x.size * itemsize),      # pure-bandwidth op
    )(x)


# ----------------------------------------------------------------------------
# Public op
# ----------------------------------------------------------------------------
def straight_through(x: jax.Array, *, force_pallas_copy: bool = False) -> jax.Array:
    """StraightThrough.forward: identity.

    Default (recommended, what production frameworks do): return `x` as-is —
    zero kernels, zero HBM traffic.

    force_pallas_copy=True: run the Pallas HBM->HBM DMA kernel instead
    (benchmarking, or when a physically distinct output buffer is required).
    """
    if not force_pallas_copy or x.size == 0:
        return x
    return _pallas_identity_copy(x)


# Straight-through-estimator variant for the quantizer use-case:
# forward and backward are both pure passthroughs (no kernel either way).
@jax.custom_vjp
def straight_through_ste(x):
    return x


def _ste_fwd(x):
    return x, None


def _ste_bwd(_, g):
    return (g,)


straight_through_ste.defvjp(_ste_fwd, _ste_bwd)


if __name__ == "__main__":
    key = jax.random.PRNGKey(0)

    # Small NCHW input consistent with a conv-style activation tensor.
    x = jax.random.normal(key, (2, 4, 16, 16), dtype=jnp.float32)

    # Recommended zero-cost path.
    y0 = jax.block_until_ready(straight_through(x))
    assert y0.shape == x.shape and y0.dtype == x.dtype
    assert bool(jnp.all(y0 == x))

    # Pallas DMA-copy path (mandated-kernel / benchmark path).
    y1 = jax.block_until_ready(straight_through(x, force_pallas_copy=True))
    assert y1.shape == x.shape and y1.dtype == x.dtype
    assert bool(jnp.all(y1 == x))

    # bf16 input exercising the same DMA path at a different dtype/size.
    x2 = jax.random.normal(key, (4, 8, 32, 32), dtype=jnp.bfloat16)
    y2 = jax.block_until_ready(straight_through(x2, force_pallas_copy=True))
    assert y2.shape == x2.shape and y2.dtype == x2.dtype
    assert bool(jnp.all(y2 == x2))

    # Non-128-divisible element count: the whole-array DMA has no lane/sublane
    # divisibility constraints, so the old _lane_width fallback hazard is gone.
    x3 = jax.random.normal(key, (2, 3, 5, 7), dtype=jnp.float32)
    y3 = jax.block_until_ready(straight_through(x3, force_pallas_copy=True))
    assert y3.shape == x3.shape and y3.dtype == x3.dtype
    assert bool(jnp.all(y3 == x3))

    # STE wrapper: forward is identity too.
    y4 = jax.block_until_ready(straight_through_ste(x))
    assert bool(jnp.all(y4 == x))

    print("KERNEL_OK")
</pallas_src>

<mosaic_0001>
module attributes {stable_mosaic.version = 11 : i64} {
  func.func @_dma_copy_kernel(%arg0: memref<2x4x16x16xf32, #tpu.memory_space<any>>, %arg1: memref<2x4x16x16xf32, #tpu.memory_space<any>>, %arg2: memref<!tpu.dma_semaphore, #tpu.memory_space<semaphore_mem>>) attributes {dimension_semantics = [], scalar_prefetch = 0 : i64, scratch_operands = 1 : i64, tpu.core_type = #tpu.core_type<tc>} {
    tpu.enqueue_dma source(%arg0 : memref<2x4x16x16xf32, #tpu.memory_space<any>>) target(%arg1 : memref<2x4x16x16xf32, #tpu.memory_space<any>>) target_semaphore(%arg2 : memref<!tpu.dma_semaphore, #tpu.memory_space<semaphore_mem>>)
    tpu.wait_dma2 semaphore(%arg2 : memref<!tpu.dma_semaphore, #tpu.memory_space<semaphore_mem>>) src(%arg0 : memref<2x4x16x16xf32, #tpu.memory_space<any>>) dst(%arg1 : memref<2x4x16x16xf32, #tpu.memory_space<any>>)
    return
  }
}

</mosaic_0001>

<bundles_post_ra>
// kernel: tpu_custom_call.1
= control target key start
LH: loop header
LB: loop body
LE: loop exit
PB: predicated region body
PF: predicated region fallthrough
CT: control target
= control target key end

     0   :  { %s36_s6 = smov [#allocation2]   ;;  %s37_s7 = smov [#allocation3]   ;;  %s55_s0 = inlined_call_operand.hbm [shape: f32[2,4,16,16], index: 0, kind: input, shape index: {}]   ;;  %s56_s1 = inlined_call_operand.hbm [shape: f32[2,4,16,16], index: 1, kind: output, shape index: {}]  }
   0x1   :  { %s38_s8 = smov 0  }
   0x2   :  { %18 = dma.general %s55_s0, 2048, %s56_s1, %s36_s6, %s37_s7, [#allocation4], %s38_s8, 0  }
   0x3   :  { %34 = dma.done.wait [#allocation2], 2048 }
   0x4   :  { %35 = vsyncadd [#allocation2], 4294965248 }
   0x5   :  { %24 = vsyncmov [#allocation2] }
   0x8   :  { %s25_s13 = vpop.sfrf %24 }
   0x9   :  { %p30_p0 = scmp.ne.s32.totalorder %s25_s13, 0 }
   0xb   :  { %29 = shalt.err (%p30_p0)  }

</bundles_post_ra>
